<compile_context>
chip_gen: v7x
topology: tpu7x:2x2x1
jax: 0.10.0
libtpu: 0.0.40
codegen_flags: <defaults>
</compile_context>

<pallas_src>
import jax
import jax.numpy as jnp
from jax.experimental import pallas as pl
from jax.experimental.pallas import tpu as pltpu


# Layer dims (in, out) for the default Adult / linear-mode configuration.
LAYER_DIMS = [
    (14, 64),   # accuracy_layers_part_1[0]
    (64, 32),   # accuracy_layers_part_1[1]
    (32, 32),   # fairness_layers[0]
    (32, 32),   # fairness_layers[1]
    (32, 32),   # fairness_layers[2]
    (32, 1),    # accuracy_layers_part_2[0]  -> sigmoid
]


def mlp_kernel(x_ref,
               w1_ref, b1_ref,
               w2_ref, b2_ref,
               wf1_ref, bf1_ref,
               wf2_ref, bf2_ref,
               wf3_ref, bf3_ref,
               wo_ref, bo_ref,
               o_ref):
    """Fused MLP, feature-major: h is (features, TB), weights are (out, in)."""
    def lin_relu(w_ref, b_ref, h):
        y = jnp.dot(w_ref[...], h, preferred_element_type=jnp.float32) + b_ref[...]
        return jnp.maximum(y, 0.0)

    h = x_ref[...].astype(jnp.float32)          # (14, TB)
    # accuracy_layers_part_1: Linear(14,64), Linear(64,32) with ReLU
    h = lin_relu(w1_ref, b1_ref, h)             # (64, TB)
    h = lin_relu(w2_ref, b2_ref, h)             # (32, TB)
    # fairness_layers (mode='linear'): three Linear(32,32) with ReLU
    h = lin_relu(wf1_ref, bf1_ref, h)
    h = lin_relu(wf2_ref, bf2_ref, h)
    h = lin_relu(wf3_ref, bf3_ref, h)
    # accuracy_layers_part_2: Linear(32,1) -> sigmoid; lane-dense (1, TB) result
    logits = jnp.dot(wo_ref[...], h, preferred_element_type=jnp.float32) + bo_ref[...]
    o_ref[...] = jax.nn.sigmoid(logits)         # (1, TB) dense store


def attribute_classifier_ablation(x, params, tb=512):
    """x: (B, 14) float32.  params: list of (W, b) with W (out, in), b (out,).

    Returns (B, 1) float32 probabilities (matches the PyTorch forward).
    """
    B, F_in = x.shape

    # Pick a lane-aligned batch tile; pad B to a multiple of it.
    tb_eff = tb if B >= tb else max(128, ((B + 127) // 128) * 128)
    b_pad = pl.cdiv(B, tb_eff) * tb_eff

    x_t = jnp.transpose(x.astype(jnp.float32))          # (14, B) feature-major
    if b_pad != B:
        x_t = jnp.pad(x_t, ((0, 0), (0, b_pad - B)))    # padded rows are discarded

    flat_args = [x_t]
    in_specs = [pl.BlockSpec((F_in, tb_eff), lambda i: (0, i))]
    for w, b in params:
        out_dim, in_dim = w.shape
        b2d = b.reshape(out_dim, 1).astype(jnp.float32)
        flat_args.append(w.astype(jnp.float32))
        flat_args.append(b2d)
        # Weights/biases: full-array blocks, constant index_map -> DMA'd once,
        # stay VMEM-resident for the whole grid.
        in_specs.append(pl.BlockSpec((out_dim, in_dim), lambda i: (0, 0)))
        in_specs.append(pl.BlockSpec((out_dim, 1), lambda i: (0, 0)))

    # Cost estimate for XLA's scheduler.
    flops_per_row = 2 * sum(di * do for di, do in LAYER_DIMS)
    weight_bytes = sum((di * do + do) * 4 for di, do in LAYER_DIMS)
    cost = pl.CostEstimate(
        flops=flops_per_row * b_pad,
        transcendentals=b_pad,                                  # sigmoid
        bytes_accessed=b_pad * (F_in + 1) * 4 + weight_bytes,
    )

    out = pl.pallas_call(
        mlp_kernel,
        out_shape=jax.ShapeDtypeStruct((1, b_pad), jnp.float32),
        grid=(b_pad // tb_eff,),
        in_specs=in_specs,
        out_specs=pl.BlockSpec((1, tb_eff), lambda i: (0, i)),
        compiler_params=pltpu.CompilerParams(
            dimension_semantics=("parallel",),
        ),
        cost_estimate=cost,
    )(*flat_args)

    # (1, b_pad) -> (B, 1)
    return jnp.transpose(out[:, :B])


def init_params(key):
    """Deterministic init mimicking nn.Linear default: U(-1/sqrt(fan_in), 1/sqrt(fan_in)).
    Weights stored in PyTorch layout (out, in); biases (out,)."""
    params = []
    for (fan_in, fan_out) in LAYER_DIMS:
        key, kw, kb = jax.random.split(key, 3)
        bound = 1.0 / (fan_in ** 0.5)
        w = jax.random.uniform(kw, (fan_out, fan_in), jnp.float32, -bound, bound)
        b = jax.random.uniform(kb, (fan_out,), jnp.float32, -bound, bound)
        params.append((w, b))
    return params


def reference_forward(x, params):
    """Pure-JAX reference (same semantics as the PyTorch forward, mode='linear')."""
    h = x
    for i, (w, b) in enumerate(params):
        h = h @ w.T + b
        if i != len(params) - 1:
            h = jnp.maximum(h, 0.0)
        else:
            h = jax.nn.sigmoid(h)
    return h


if __name__ == "__main__":
    key = jax.random.PRNGKey(0)
    key, kx = jax.random.split(key)
    B = 8
    x = jax.random.normal(kx, (B, 14), dtype=jnp.float32)

    params = init_params(key)

    out = attribute_classifier_ablation(x, params)
    out = jax.block_until_ready(out)

    ref = reference_forward(x, params)
    assert out.shape == (B, 1)
    assert jnp.allclose(out, ref, atol=1e-5, rtol=1e-5), "mismatch vs reference"

    print("KERNEL_OK")
</pallas_src>

<mosaic_0001>
module attributes {stable_mosaic.version = 11 : i64} {
  func.func @mlp_kernel(%arg0: i32, %arg1: memref<14x128xf32, #tpu.memory_space<vmem>>, %arg2: memref<64x14xf32, #tpu.memory_space<vmem>>, %arg3: memref<64x1xf32, #tpu.memory_space<vmem>>, %arg4: memref<32x64xf32, #tpu.memory_space<vmem>>, %arg5: memref<32x1xf32, #tpu.memory_space<vmem>>, %arg6: memref<32x32xf32, #tpu.memory_space<vmem>>, %arg7: memref<32x1xf32, #tpu.memory_space<vmem>>, %arg8: memref<32x32xf32, #tpu.memory_space<vmem>>, %arg9: memref<32x1xf32, #tpu.memory_space<vmem>>, %arg10: memref<32x32xf32, #tpu.memory_space<vmem>>, %arg11: memref<32x1xf32, #tpu.memory_space<vmem>>, %arg12: memref<1x32xf32, #tpu.memory_space<vmem>>, %arg13: memref<1x1xf32, #tpu.memory_space<vmem>>, %arg14: memref<1x128xf32, #tpu.memory_space<vmem>>) attributes {dimension_semantics = [#tpu.dimension_semantics<parallel>], iteration_bounds = array<i64: 1>, scalar_prefetch = 0 : i64, scratch_operands = 0 : i64, tpu.core_type = #tpu.core_type<tc>, window_params = [{transform_indices = @transform_0, window_bounds = array<i64: 14, 128>}, {pipeline_mode = #tpu.pipeline_mode<synchronous>, transform_indices = @transform_1, window_bounds = array<i64: 64, 14>}, {pipeline_mode = #tpu.pipeline_mode<synchronous>, transform_indices = @transform_2, window_bounds = array<i64: 64, 1>}, {pipeline_mode = #tpu.pipeline_mode<synchronous>, transform_indices = @transform_3, window_bounds = array<i64: 32, 64>}, {pipeline_mode = #tpu.pipeline_mode<synchronous>, transform_indices = @transform_4, window_bounds = array<i64: 32, 1>}, {pipeline_mode = #tpu.pipeline_mode<synchronous>, transform_indices = @transform_5, window_bounds = array<i64: 32, 32>}, {pipeline_mode = #tpu.pipeline_mode<synchronous>, transform_indices = @transform_6, window_bounds = array<i64: 32, 1>}, {pipeline_mode = #tpu.pipeline_mode<synchronous>, transform_indices = @transform_7, window_bounds = array<i64: 32, 32>}, {pipeline_mode = #tpu.pipeline_mode<synchronous>, transform_indices = @transform_8, window_bounds = array<i64: 32, 1>}, {pipeline_mode = #tpu.pipeline_mode<synchronous>, transform_indices = @transform_9, window_bounds = array<i64: 32, 32>}, {pipeline_mode = #tpu.pipeline_mode<synchronous>, transform_indices = @transform_10, window_bounds = array<i64: 32, 1>}, {pipeline_mode = #tpu.pipeline_mode<synchronous>, transform_indices = @transform_11, window_bounds = array<i64: 1, 32>}, {pipeline_mode = #tpu.pipeline_mode<synchronous>, transform_indices = @transform_12, window_bounds = array<i64: 1, 1>}, {transform_indices = @transform_13, window_bounds = array<i64: 1, 128>}]} {
    %c0 = arith.constant 0 : index
    %c0_0 = arith.constant 0 : index
    %0 = vector.load %arg1[%c0, %c0_0] : memref<14x128xf32, #tpu.memory_space<vmem>>, vector<14x128xf32>
    %c0_1 = arith.constant 0 : index
    %c0_2 = arith.constant 0 : index
    %1 = vector.load %arg2[%c0_1, %c0_2] : memref<64x14xf32, #tpu.memory_space<vmem>>, vector<64x14xf32>
    %cst = arith.constant dense<0.000000e+00> : vector<64x128xf32>
    %2 = tpu.matmul %1, %0, %cst {dimension_numbers = #tpu.dot_dimension_numbers<[1], [0], [0], [1], [0, 0, 1, 1], [], []>} : vector<64x14xf32>, vector<14x128xf32>, vector<64x128xf32> -> vector<64x128xf32>
    %c0_3 = arith.constant 0 : index
    %c0_4 = arith.constant 0 : index
    %3 = vector.load %arg3[%c0_3, %c0_4] : memref<64x1xf32, #tpu.memory_space<vmem>>, vector<64x1xf32>
    %4 = vector.broadcast %3 : vector<64x1xf32> to vector<64x128xf32>
    %5 = arith.addf %2, %4 : vector<64x128xf32>
    %cst_5 = arith.constant 0.000000e+00 : f32
    %6 = vector.broadcast %cst_5 : f32 to vector<64x128xf32>
    %7 = arith.maximumf %5, %6 : vector<64x128xf32>
    %c0_6 = arith.constant 0 : index
    %c0_7 = arith.constant 0 : index
    %8 = vector.load %arg4[%c0_6, %c0_7] : memref<32x64xf32, #tpu.memory_space<vmem>>, vector<32x64xf32>
    %cst_8 = arith.constant dense<0.000000e+00> : vector<32x128xf32>
    %9 = tpu.matmul %8, %7, %cst_8 {dimension_numbers = #tpu.dot_dimension_numbers<[1], [0], [0], [1], [0, 0, 1, 1], [], []>} : vector<32x64xf32>, vector<64x128xf32>, vector<32x128xf32> -> vector<32x128xf32>
    %c0_9 = arith.constant 0 : index
    %c0_10 = arith.constant 0 : index
    %10 = vector.load %arg5[%c0_9, %c0_10] : memref<32x1xf32, #tpu.memory_space<vmem>>, vector<32x1xf32>
    %11 = vector.broadcast %10 : vector<32x1xf32> to vector<32x128xf32>
    %12 = arith.addf %9, %11 : vector<32x128xf32>
    %cst_11 = arith.constant 0.000000e+00 : f32
    %13 = vector.broadcast %cst_11 : f32 to vector<32x128xf32>
    %14 = arith.maximumf %12, %13 : vector<32x128xf32>
    %c0_12 = arith.constant 0 : index
    %c0_13 = arith.constant 0 : index
    %15 = vector.load %arg6[%c0_12, %c0_13] : memref<32x32xf32, #tpu.memory_space<vmem>>, vector<32x32xf32>
    %cst_14 = arith.constant dense<0.000000e+00> : vector<32x128xf32>
    %16 = tpu.matmul %15, %14, %cst_14 {dimension_numbers = #tpu.dot_dimension_numbers<[1], [0], [0], [1], [0, 0, 1, 1], [], []>} : vector<32x32xf32>, vector<32x128xf32>, vector<32x128xf32> -> vector<32x128xf32>
    %c0_15 = arith.constant 0 : index
    %c0_16 = arith.constant 0 : index
    %17 = vector.load %arg7[%c0_15, %c0_16] : memref<32x1xf32, #tpu.memory_space<vmem>>, vector<32x1xf32>
    %18 = vector.broadcast %17 : vector<32x1xf32> to vector<32x128xf32>
    %19 = arith.addf %16, %18 : vector<32x128xf32>
    %cst_17 = arith.constant 0.000000e+00 : f32
    %20 = vector.broadcast %cst_17 : f32 to vector<32x128xf32>
    %21 = arith.maximumf %19, %20 : vector<32x128xf32>
    %c0_18 = arith.constant 0 : index
    %c0_19 = arith.constant 0 : index
    %22 = vector.load %arg8[%c0_18, %c0_19] : memref<32x32xf32, #tpu.memory_space<vmem>>, vector<32x32xf32>
    %cst_20 = arith.constant dense<0.000000e+00> : vector<32x128xf32>
    %23 = tpu.matmul %22, %21, %cst_20 {dimension_numbers = #tpu.dot_dimension_numbers<[1], [0], [0], [1], [0, 0, 1, 1], [], []>} : vector<32x32xf32>, vector<32x128xf32>, vector<32x128xf32> -> vector<32x128xf32>
    %c0_21 = arith.constant 0 : index
    %c0_22 = arith.constant 0 : index
    %24 = vector.load %arg9[%c0_21, %c0_22] : memref<32x1xf32, #tpu.memory_space<vmem>>, vector<32x1xf32>
    %25 = vector.broadcast %24 : vector<32x1xf32> to vector<32x128xf32>
    %26 = arith.addf %23, %25 : vector<32x128xf32>
    %cst_23 = arith.constant 0.000000e+00 : f32
    %27 = vector.broadcast %cst_23 : f32 to vector<32x128xf32>
    %28 = arith.maximumf %26, %27 : vector<32x128xf32>
    %c0_24 = arith.constant 0 : index
    %c0_25 = arith.constant 0 : index
    %29 = vector.load %arg10[%c0_24, %c0_25] : memref<32x32xf32, #tpu.memory_space<vmem>>, vector<32x32xf32>
    %cst_26 = arith.constant dense<0.000000e+00> : vector<32x128xf32>
    %30 = tpu.matmul %29, %28, %cst_26 {dimension_numbers = #tpu.dot_dimension_numbers<[1], [0], [0], [1], [0, 0, 1, 1], [], []>} : vector<32x32xf32>, vector<32x128xf32>, vector<32x128xf32> -> vector<32x128xf32>
    %c0_27 = arith.constant 0 : index
    %c0_28 = arith.constant 0 : index
    %31 = vector.load %arg11[%c0_27, %c0_28] : memref<32x1xf32, #tpu.memory_space<vmem>>, vector<32x1xf32>
    %32 = vector.broadcast %31 : vector<32x1xf32> to vector<32x128xf32>
    %33 = arith.addf %30, %32 : vector<32x128xf32>
    %cst_29 = arith.constant 0.000000e+00 : f32
    %34 = vector.broadcast %cst_29 : f32 to vector<32x128xf32>
    %35 = arith.maximumf %33, %34 : vector<32x128xf32>
    %c0_30 = arith.constant 0 : index
    %c0_31 = arith.constant 0 : index
    %36 = vector.load %arg12[%c0_30, %c0_31] : memref<1x32xf32, #tpu.memory_space<vmem>>, vector<1x32xf32>
    %cst_32 = arith.constant dense<0.000000e+00> : vector<1x128xf32>
    %37 = tpu.matmul %36, %35, %cst_32 {dimension_numbers = #tpu.dot_dimension_numbers<[1], [0], [0], [1], [0, 0, 1, 1], [], []>} : vector<1x32xf32>, vector<32x128xf32>, vector<1x128xf32> -> vector<1x128xf32>
    %c0_33 = arith.constant 0 : index
    %c0_34 = arith.constant 0 : index
    %38 = vector.load %arg13[%c0_33, %c0_34] : memref<1x1xf32, #tpu.memory_space<vmem>>, vector<1x1xf32>
    %39 = vector.broadcast %38 : vector<1x1xf32> to vector<1x128xf32>
    %40 = arith.addf %37, %39 : vector<1x128xf32>
    %41 = arith.negf %40 : vector<1x128xf32>
    %42 = math.exp %41 : vector<1x128xf32>
    %cst_35 = arith.constant 1.000000e+00 : f32
    %43 = vector.broadcast %cst_35 : f32 to vector<1x128xf32>
    %44 = arith.addf %43, %42 : vector<1x128xf32>
    %45 = arith.divf %43, %44 : vector<1x128xf32>
    %c0_36 = arith.constant 0 : index
    %c0_37 = arith.constant 0 : index
    %46 = vector.load %arg14[%c0_36, %c0_37] : memref<1x128xf32, #tpu.memory_space<vmem>>, vector<1x128xf32>
    tpu.vector_store %arg14[%c0_36, %c0_37], %45 {strides = array<i32>} : memref<1x128xf32, #tpu.memory_space<vmem>>, vector<1x128xf32>,
    return
  }
  func.func @transform_0(%arg0: i32) -> (i32, i32) {
    %c0_i32 = arith.constant 0 : i32
    %c0_i32_0 = arith.constant 0 : i32
    return %c0_i32, %arg0 : i32, i32
  }
  func.func @transform_1(%arg0: i32) -> (i32, i32) {
    %c0_i32 = arith.constant 0 : i32
    %c0_i32_0 = arith.constant 0 : i32
    %c0_i32_1 = arith.constant 0 : i32
    return %c0_i32, %c0_i32_0 : i32, i32
  }
  func.func @transform_2(%arg0: i32) -> (i32, i32) {
    %c0_i32 = arith.constant 0 : i32
    %c0_i32_0 = arith.constant 0 : i32
    %c0_i32_1 = arith.constant 0 : i32
    return %c0_i32, %c0_i32_0 : i32, i32
  }
  func.func @transform_3(%arg0: i32) -> (i32, i32) {
    %c0_i32 = arith.constant 0 : i32
    %c0_i32_0 = arith.constant 0 : i32
    %c0_i32_1 = arith.constant 0 : i32
    return %c0_i32, %c0_i32_0 : i32, i32
  }
  func.func @transform_4(%arg0: i32) -> (i32, i32) {
    %c0_i32 = arith.constant 0 : i32
    %c0_i32_0 = arith.constant 0 : i32
    %c0_i32_1 = arith.constant 0 : i32
    return %c0_i32, %c0_i32_0 : i32, i32
  }
  func.func @transform_5(%arg0: i32) -> (i32, i32) {
    %c0_i32 = arith.constant 0 : i32
    %c0_i32_0 = arith.constant 0 : i32
    %c0_i32_1 = arith.constant 0 : i32
    return %c0_i32, %c0_i32_0 : i32, i32
  }
  func.func @transform_6(%arg0: i32) -> (i32, i32) {
    %c0_i32 = arith.constant 0 : i32
    %c0_i32_0 = arith.constant 0 : i32
    %c0_i32_1 = arith.constant 0 : i32
    return %c0_i32, %c0_i32_0 : i32, i32
  }
  func.func @transform_7(%arg0: i32) -> (i32, i32) {
    %c0_i32 = arith.constant 0 : i32
    %c0_i32_0 = arith.constant 0 : i32
    %c0_i32_1 = arith.constant 0 : i32
    return %c0_i32, %c0_i32_0 : i32, i32
  }
  func.func @transform_8(%arg0: i32) -> (i32, i32) {
    %c0_i32 = arith.constant 0 : i32
    %c0_i32_0 = arith.constant 0 : i32
    %c0_i32_1 = arith.constant 0 : i32
    return %c0_i32, %c0_i32_0 : i32, i32
  }
  func.func @transform_9(%arg0: i32) -> (i32, i32) {
    %c0_i32 = arith.constant 0 : i32
    %c0_i32_0 = arith.constant 0 : i32
    %c0_i32_1 = arith.constant 0 : i32
    return %c0_i32, %c0_i32_0 : i32, i32
  }
  func.func @transform_10(%arg0: i32) -> (i32, i32) {
    %c0_i32 = arith.constant 0 : i32
    %c0_i32_0 = arith.constant 0 : i32
    %c0_i32_1 = arith.constant 0 : i32
    return %c0_i32, %c0_i32_0 : i32, i32
  }
  func.func @transform_11(%arg0: i32) -> (i32, i32) {
    %c0_i32 = arith.constant 0 : i32
    %c0_i32_0 = arith.constant 0 : i32
    %c0_i32_1 = arith.constant 0 : i32
    return %c0_i32, %c0_i32_0 : i32, i32
  }
  func.func @transform_12(%arg0: i32) -> (i32, i32) {
    %c0_i32 = arith.constant 0 : i32
    %c0_i32_0 = arith.constant 0 : i32
    %c0_i32_1 = arith.constant 0 : i32
    return %c0_i32, %c0_i32_0 : i32, i32
  }
  func.func @transform_13(%arg0: i32) -> (i32, i32) {
    %c0_i32 = arith.constant 0 : i32
    %c0_i32_0 = arith.constant 0 : i32
    return %c0_i32, %arg0 : i32, i32
  }
}

</mosaic_0001>

<bundles_post_ra>
// kernel: tpu_custom_call.1
= control target key start
LH: loop header
LB: loop body
LE: loop exit
PB: predicated region body
PF: predicated region fallthrough
CT: control target
= control target key end

     0   :  { %s1396_s0 = inlined_call_operand.vmem [shape: f32[14,128], index: 0, kind: input, shape index: {}]   ;;  %s1397_s1 = inlined_call_operand.vmem [shape: f32[64,14], index: 1, kind: input, shape index: {}]   ;;  %s1398_s2 = inlined_call_operand.vmem [shape: f32[64,1], index: 2, kind: input, shape index: {}]   ;;  %s1399_s3 = inlined_call_operand.vmem [shape: f32[32,64], index: 3, kind: input, shape index: {}]   ;;  %s1400_s4 = inlined_call_operand.vmem [shape: f32[32,1], index: 4, kind: input, shape index: {}]   ;;  %s1401_s5 = inlined_call_operand.vmem [shape: f32[32,32], index: 5, kind: input, shape index: {}]   ;;  %s1402_s6 = inlined_call_operand.vmem [shape: f32[32,1], index: 6, kind: input, shape index: {}]   ;;  %s1403_s7 = inlined_call_operand.vmem [shape: f32[32,32], index: 7, kind: input, shape index: {}]   ;;  %s1404_s8 = inlined_call_operand.vmem [shape: f32[32,1], index: 8, kind: input, shape index: {}]   ;;  %s1405_s9 = inlined_call_operand.vmem [shape: f32[32,32], index: 9, kind: input, shape index: {}]   ;;  %s1406_s10 = inlined_call_operand.vmem [shape: f32[32,1], index: 10, kind: input, shape index: {}]   ;;  %s1407_s11 = inlined_call_operand.vmem [shape: f32[1,32], index: 11, kind: input, shape index: {}]   ;;  %s1408_s12 = inlined_call_operand.<no memory space> [shape: f32[1,1], index: 12, kind: input, shape index: {}]   ;;  %s1409_s13 = inlined_call_operand.hbm [shape: f32[1,128], index: 13, kind: output, shape index: {}]  }
   0x1   :  { %v18_v0 = vstv %s1408_s12 }
   0x2   :  { %19 = vst [vmem:[#allocation2] sm:$0x1] %v18_v0 }
   0x3   :  { %v47_v1 = vld [vmem:[%s1396_s0] sm:$0xff]  ;;  %v48_v2 = vld [vmem:[%s1396_s0 + $0x8] sm:$0x3f]  ;;  %vm130_vm0 = vcmask 1045504   ;;  %vm1127_vm1 = vmmov 1   ;;  %vm105_vm3 = vcmask 113664  }
   0x4   :  { %v49_v3 = vld [vmem:[%s1397_s1] sm:$0xff]  ;;  %v1039_v4 = vpack.c.bf16 %v48_v2, %v47_v1  ;;  %vm1040_vm2 = vmpackc.low %vm130_vm0, %vm1127_vm1  ;;  %v1128_v5 = vmov 0   ;;  %v50_v7 = vld [vmem:[%s1397_s1 + $0x8] sm:$0xff] }
   0x5   :  { %952 = vmatprep.mubr.msk.f32.mxu0 %vm105_vm3, %v49_v3  ;;  %1097 = vset.pattern.permute.xlu0 %v1128_v5  ;;  %v57_v6 = vld [vmem:[%s1398_s2] sm:$0xff]  ;;  %v59_v8 = vld [vmem:[%s1398_s2 + $0x10] sm:$0xff]  ;;  %v58_v10 = vld [vmem:[%s1398_s2 + $0x8] sm:$0xff] }
   0x6   :  { %1041 = vmatprep.subr.msk.bf16.mxu0 %vm1040_vm2, %v1039_v4  ;;  %1098 = vset.pattern.permute.xlu1 %v1128_v5  ;;  %v51_v9 = vld [vmem:[%s1397_s1 + $0x10] sm:$0xff]  ;;  %v60_v11 = vld [vmem:[%s1398_s2 + $0x18] sm:$0xff]  ;;  %v53_v13 = vld [vmem:[%s1397_s1 + $0x20] sm:$0xff] }
   0x7   :  { %1044 = vmatpush3.bf16.msk.msra.mxu0 %vm1040_vm2, %v1039_v4  ;;  %67 = vperm.xlu0 %1097, %v57_v6   ;;  %v52_v12 = vld [vmem:[%s1397_s1 + $0x18] sm:$0xff]  ;;  %v61_v14 = vld [vmem:[%s1398_s2 + $0x20] sm:$0xff]  ;;  %v62_v15 = vld [vmem:[%s1398_s2 + $0x28] sm:$0xff] }
   0x8   :  { %77 = vperm.xlu1 %1098, %v59_v8   ;;  %v54_v16 = vld [vmem:[%s1397_s1 + $0x28] sm:$0xff] }
   0xa   :  { %953 = vmatmul.mubr.msk.f32.vlgmr.msra.gmra.mrb[0].mxu0 %vm105_vm3, %v50_v7 }
   0xb   :  { %955 = vmatprep.mubr.msk.f32.mxu0 %vm105_vm3, %v51_v9  ;;  %72 = vperm.xlu0 %1097, %v58_v10  }
   0xc   :  { %82 = vperm.xlu1 %1098, %v60_v11  }
   0xe   :  { %956 = vmatmul.mubr.msk.f32.gmra.mrb[2].mxu0 %vm105_vm3, %v52_v12 }
   0xf   :  { %958 = vmatprep.mubr.msk.f32.mxu0 %vm105_vm3, %v53_v13  ;;  %87 = vperm.xlu0 %1097, %v61_v14  }
  0x10   :  { %20 = vsyncpa [#allocation4], 0  ;;  %v55_v17 = vld [vmem:[%s1397_s1 + $0x30] sm:$0xff]  ;;  %92 = vperm.xlu1 %1098, %v62_v15   ;;  %v64_v19 = vld [vmem:[%s1398_s2 + $0x38] sm:$0xff]  ;;  %vm275_vm4 = vcmask 523264   ;;  %vm405_vm5 = vcmask 261120  }
  0x11   :  { %v63_v18 = vld [vmem:[%s1398_s2 + $0x30] sm:$0xff]  ;;  %v56_v20 = vld [vmem:[%s1397_s1 + $0x38] sm:$0xff]  ;;  %v251_v21 = vld [vmem:[%s1400_s4] sm:$0xff]  ;;  %vm1130_vm6 = vmmov 0   ;;  %s1132_s0 = smov [#allocation3]  }
  0x12   :  { %959 = vmatmul.mubr.msk.f32.gmra.mrb[4].mxu0 %vm105_vm3, %v54_v16  ;;  %v252_v22 = vld [vmem:[%s1400_s4 + $0x8] sm:$0xff]  ;;  %v253_v23 = vld [vmem:[%s1400_s4 + $0x10] sm:$0xff]  ;;  %v254_v24 = vld [vmem:[%s1400_s4 + $0x18] sm:$0xff]  ;;  %s862_s17 = sshll.u32 %s1132_s0, 4  ;;  %s863_s17 = int_to_ptr.vmem [resolvable:$true] %s862_s17 }
  0x13   :  { %961 = vmatprep.mubr.msk.f32.mxu0 %vm105_vm3, %v55_v17  ;;  %97 = vperm.xlu0 %1097, %v63_v18   ;;  %v381_v25 = vld [vmem:[%s1402_s6] sm:$0xff]  ;;  %v382_v26 = vld [vmem:[%s1402_s6 + $0x8] sm:$0xff]  ;;  %v383_v27 = vld [vmem:[%s1402_s6 + $0x10] sm:$0xff]  ;;  %s1107_s18 = scalar_lea.vmem %s863_s17, 32  ;;  %p1108_p1 = scmp.lt.s32.totalorder %s863_s17, %s863_s17 }
  0x14   :  { %102 = vperm.xlu1 %1098, %v64_v19   ;;  %v384_v28 = vld [vmem:[%s1402_s6 + $0x18] sm:$0xff]  ;;  %v511_v29 = vld [vmem:[%s1404_s8] sm:$0xff]  ;;  %v512_v30 = vld [vmem:[%s1404_s8 + $0x8] sm:$0xff] }
  0x15   :  { %v513_v31 = vld [vmem:[%s1404_s8 + $0x10] sm:$0xff]  ;;  %v514_v32 = vld [vmem:[%s1404_s8 + $0x18] sm:$0xff]  ;;  %v640_v33 = vld [vmem:[%s1406_s10] sm:$0xff] }
  0x16   :  { %962 = vmatmul.mubr.msk.f32.gmra.mrb[6].mxu0 %vm105_vm3, %v56_v20  ;;  %v641_v34 = vld [vmem:[%s1406_s10 + $0x8] sm:$0xff]  ;;  %v642_v35 = vld [vmem:[%s1406_s10 + $0x10] sm:$0xff]  ;;  %v643_v36 = vld [vmem:[%s1406_s10 + $0x18] sm:$0xff] }
  0x17   :  { %257 = vperm.xlu0 %1097, %v251_v21   ;;  %v766_v37 = vld [vmem:[#allocation2] sm:$0x1]  ;;  %v248_v11 = vld [vmem:[%s1399_s3 + $0x8] sm:$0xff]  ;;  %v249_v12 = vld [vmem:[%s1399_s3 + $0x10] sm:$0xff] }
  0x18   :  { %262 = vperm.xlu1 %1098, %v252_v22   ;;  %v247_v38 = vld [vmem:[%s1399_s3] sm:$0xff]  ;;  %v250_v13 = vld [vmem:[%s1399_s3 + $0x18] sm:$0xff] }
  0x19   :  { %980 = vmatprep.mubr.msk.f32.mxu1 %vm275_vm4, %v247_v38  ;;  %v377_v14 = vld [vmem:[%s1401_s5] sm:$0xff] }
  0x1a   :  { %994 = vmatprep.mubr.msk.f32.mxu0 %vm405_vm5, %v377_v14  ;;  %v638_v14 = vld [vmem:[%s1405_s9 + $0x10] sm:$0xff] }
  0x1b   :  { %267 = vperm.xlu0 %1097, %v253_v23  }
  0x1c   :  { %272 = vperm.xlu1 %1098, %v254_v24  }
  0x1f   :  { %387 = vperm.xlu0 %1097, %v381_v25  }
  0x20   :  { %392 = vperm.xlu1 %1098, %v382_v26  }
  0x23   :  { %397 = vperm.xlu0 %1097, %v383_v27  }
  0x24   :  { %402 = vperm.xlu1 %1098, %v384_v28  }
  0x27   :  { %517 = vperm.xlu0 %1097, %v511_v29  }
  0x28   :  { %522 = vperm.xlu1 %1098, %v512_v30  }
  0x2b   :  { %527 = vperm.xlu0 %1097, %v513_v31  }
  0x2c   :  { %532 = vperm.xlu1 %1098, %v514_v32  }
  0x2f   :  { %646 = vperm.xlu0 %1097, %v640_v33   ;;  %v378_v33 = vld [vmem:[%s1401_s5 + $0x8] sm:$0xff] }
  0x30   :  { %651 = vperm.xlu1 %1098, %v641_v34   ;;  %v379_v34 = vld [vmem:[%s1401_s5 + $0x10] sm:$0xff] }
  0x33   :  { %656 = vperm.xlu0 %1097, %v642_v35   ;;  %v380_v35 = vld [vmem:[%s1401_s5 + $0x18] sm:$0xff] }
  0x34   :  { %661 = vperm.xlu1 %1098, %v643_v36   ;;  %v507_v36 = vld [vmem:[%s1403_s7] sm:$0xff] }
  0x37   :  { %769 = vperm.xlu0 %1097, %v766_v37  }
  0x86   :  { %v68_v39 = vpop.permute.xlu0 %67 }
  0x87   :  { %v78_v40 = vpop.permute.xlu1 %77 }
  0x8a   :  { %v73_v41 = vpop.permute.xlu0 %72 }
  0x8b   :  { %v83_v42 = vpop.permute.xlu1 %82 }
  0x8e   :  { %v88_v55 = vpop.permute.xlu0 %87 }
  0x8f   :  { %v93_v52 = vpop.permute.xlu1 %92 }
  0x92   :  { %v98_v3 = vpop.permute.xlu0 %97 }
  0x93   :  { %v103_v0 = vpop.permute.xlu1 %102 }
  0x96   :  { %v258_v16 = vpop.permute.xlu0 %257 }
  0x97   :  { %v263_v15 = vpop.permute.xlu1 %262 }
  0x9a   :  { %v268_v25 = vpop.permute.xlu0 %267 }
  0x9b   :  { %v273_v22 = vpop.permute.xlu1 %272 }
  0x9e   :  { %v388_v38 = vpop.permute.xlu0 %387 }
  0x9f   :  { %v393_v37 = vpop.permute.xlu1 %392 }
  0xdd   :  { %v954_v43 = vpop.f32.mrb[0].mxu0 }
  0xde   :  { %v206_v44 = vadd.f32 %v954_v43, %v73_v41  ;;  %v200_v45 = vpop.f32.mrb[1].mxu0 }
  0xdf   :  { %v201_v46 = vadd.f32 %v200_v45, %v68_v39 }
  0xe0   :  { %v240_v47 = vmax.f32 %v206_v44, 0.0  ;;  %v403_v44 = vpop.permute.xlu1 %402 }
  0xe1   :  { %v239_v48 = vmax.f32 %v201_v46, 0.0  ;;  %v957_v49 = vpop.f32.mrb[2].mxu0 }
  0xe2   :  { %v216_v50 = vadd.f32 %v957_v49, %v83_v42  ;;  %v210_v51 = vpop.f32.mrb[3].mxu0 }
  0xe3   :  { %v211_v53 = vadd.f32 %v210_v51, %v78_v40  ;;  %v1045_v54 = vpack.c.bf16 %v240_v47, %v239_v48  ;;  %v398_v47 = vpop.permute.xlu0 %397 }
  0xe4   :  { %v242_v56 = vmax.f32 %v216_v50, 0.0 }
  0xe5   :  { %v241_v57 = vmax.f32 %v211_v53, 0.0  ;;  %v960_v58 = vpop.f32.mrb[4].mxu0  ;;  %1046 = vmatprep.subr.bf16.mxu1 %v1045_v54 }
  0xe6   :  { %v226_v59 = vadd.f32 %v960_v58, %v93_v52  ;;  %v220_v60 = vpop.f32.mrb[5].mxu0  ;;  %1048 = vmatpush3.bf16.msra.mxu1 %v1045_v54  ;;  %v636_v58 = vld [vmem:[%s1405_s9] sm:$0xff] }
  0xe7   :  { %v1049_v61 = vpack.c.bf16 %v242_v56, %v241_v57  ;;  %v221_v62 = vadd.f32 %v220_v60, %v88_v55  ;;  %v508_v55 = vld [vmem:[%s1403_s7 + $0x8] sm:$0xff]  ;;  %v509_v56 = vld [vmem:[%s1403_s7 + $0x10] sm:$0xff]  ;;  %v510_v57 = vld [vmem:[%s1403_s7 + $0x18] sm:$0xff]  ;;  %v518_v60 = vpop.permute.xlu0 %517 }
  0xe8   :  { %v244_v63 = vmax.f32 %v226_v59, 0.0  ;;  %v523_v59 = vpop.permute.xlu1 %522 }
  0xe9   :  { %v243_v1 = vmax.f32 %v221_v62, 0.0  ;;  %v963_v2 = vpop.f32.mrb[6].mxu0  ;;  %1050 = vmatprep.subr.bf16.mxu1 %v1049_v61 }
  0xea   :  { %v236_v4 = vadd.f32 %v963_v2, %v103_v0  ;;  %v230_v5 = vpop.f32.mrb[7].mxu0  ;;  %1052 = vmatpush3.bf16.msra.mxu1 %v1049_v61 }
  0xeb   :  { %v1053_v6 = vpack.c.bf16 %v244_v63, %v243_v1  ;;  %v231_v7 = vadd.f32 %v230_v5, %v98_v3  ;;  %v528_v5 = vpop.permute.xlu0 %527 }
  0xec   :  { %v246_v8 = vmax.f32 %v236_v4, 0.0  ;;  %v533_v2 = vpop.permute.xlu1 %532 }
  0xed   :  { %v245_v9 = vmax.f32 %v231_v7, 0.0  ;;  %1054 = vmatprep.subr.bf16.mxu1 %v1053_v6 }
  0xee   :  { %1056 = vmatpush3.bf16.msra.mxu1 %v1053_v6 }
  0xef   :  { %v1057_v10 = vpack.c.bf16 %v246_v8, %v245_v9 }
  0xf1   :  { %1058 = vmatprep.subr.bf16.mxu1 %v1057_v10 }
  0xf2   :  { %1060 = vmatpush3.bf16.msra.mxu1 %v1057_v10 }
  0xf5   :  { %981 = vmatmul.mubr.msk.f32.vlgmr.msra.gmra.mrb[0].mxu1 %vm275_vm4, %v248_v11 }
  0xf6   :  { %983 = vmatprep.mubr.msk.f32.mxu1 %vm275_vm4, %v249_v12 }
  0xf9   :  { %984 = vmatmul.mubr.msk.f32.gmra.mrb[2].mxu1 %vm275_vm4, %v250_v13  ;;  %v637_v13 = vld [vmem:[%s1405_s9 + $0x8] sm:$0xff] }
  0xfa   :  { %1008 = vmatprep.mubr.msk.f32.mxu1 %vm405_vm5, %v507_v36  ;;  %v765_v36 = vld [vmem:[%s1407_s11] sm:$0x1]  ;;  %s1103_s11 = scalar_lea.vmem %s863_s17, 16 }
  0xfb   :  { %p1104_p0 = scmp.ne.s32.totalorder %s863_s17, %s1103_s11  ;;  %p1109_p2 = scmp.lt.s32.totalorder %s1107_s18, %s1103_s11 }
  0xfd   :  { %p1110_p3 = por %p1109_p2, %p1108_p1 }
  0xff   :  { %p1111_p4 = pnand %p1110_p3, %p1104_p0 }
 0x1c8   :  { %v982_v17 = vpop.f32.mrb[0].mxu1 }
 0x1c9   :  { %v360_v18 = vadd.f32 %v982_v17, %v263_v15  ;;  %v354_v19 = vpop.f32.mrb[1].mxu1  ;;  %v639_v15 = vld [vmem:[%s1405_s9 + $0x18] sm:$0xff]  ;;  %v1131_v17 = vmov 0.0  }
 0x1ca   :  { %v355_v20 = vadd.f32 %v354_v19, %v258_v16  ;;  %v1129_v16 = vmov 0.0|0.0   ;;  %v647_v19 = vpop.permute.xlu0 %646 }
 0x1cb   :  { %v374_v21 = vmax.f32 %v360_v18, 0.0  ;;  %v652_v18 = vpop.permute.xlu1 %651 }
 0x1cc   :  { %v373_v23 = vmax.f32 %v355_v20, 0.0  ;;  %v985_v24 = vpop.f32.mrb[2].mxu1 }
 0x1cd   :  { %v370_v26 = vadd.f32 %v985_v24, %v273_v22  ;;  %v364_v27 = vpop.f32.mrb[3].mxu1 }
 0x1ce   :  { %v1061_v28 = vpack.c.bf16 %v374_v21, %v373_v23  ;;  %v365_v29 = vadd.f32 %v364_v27, %v268_v25 }
 0x1cf   :  { %v376_v30 = vmax.f32 %v370_v26, 0.0  ;;  %v662_v25 = vpop.permute.xlu1 %661 }
 0x1d0   :  { %v375_v31 = vmax.f32 %v365_v29, 0.0  ;;  %1062 = vmatprep.subr.bf16.mxu0 %v1061_v28 }
 0x1d1   :  { %1064 = vmatpush3.bf16.msra.mxu0 %v1061_v28  ;;  %v657_v28 = vpop.permute.xlu0 %656 }
 0x1d2   :  { %v1065_v32 = vpack.c.bf16 %v376_v30, %v375_v31 }
 0x1d4   :  { %1066 = vmatprep.subr.bf16.mxu0 %v1065_v32 }
 0x1d5   :  { %1068 = vmatpush3.bf16.msra.mxu0 %v1065_v32 }
 0x1d8   :  { %995 = vmatmul.mubr.msk.f32.vlgmr.msra.gmra.mrb[8].mxu0 %vm405_vm5, %v378_v33 }
 0x1d9   :  { %997 = vmatprep.mubr.msk.f32.mxu0 %vm405_vm5, %v379_v34 }
 0x1dc   :  { %998 = vmatmul.mubr.msk.f32.gmra.mrb[10].mxu0 %vm405_vm5, %v380_v35 }
 0x1dd   :  { %1022 = vmatprep.mubr.msk.f32.mxu0 %vm405_vm5, %v636_v58 }
 0x2ab   :  { %v996_v39 = vpop.f32.mrb[8].mxu0 }
 0x2ac   :  { %v490_v40 = vadd.f32 %v996_v39, %v393_v37  ;;  %v484_v41 = vpop.f32.mrb[9].mxu0  ;;  %v772_v37 = vlaneseq }
 0x2ad   :  { %v485_v42 = vadd.f32 %v484_v41, %v388_v38 }
 0x2ae   :  { %v504_v43 = vmax.f32 %v490_v40, 0.0  ;;  %v773_v38 = vshrl.u32 %v772_v37, 7  ;;  %v770_v40 = vpop.permute.xlu0 %769 }
 0x2af   :  { %v503_v45 = vmax.f32 %v485_v42, 0.0  ;;  %v999_v46 = vpop.f32.mrb[10].mxu0 }
 0x2b0   :  { %v500_v48 = vadd.f32 %v999_v46, %v403_v44  ;;  %v494_v49 = vpop.f32.mrb[11].mxu0  ;;  %v774_v39 = vsub.s32 0, %v773_v38 }
 0x2b1   :  { %v1069_v50 = vpack.c.bf16 %v504_v43, %v503_v45  ;;  %v495_v51 = vadd.f32 %v494_v49, %v398_v47 }
 0x2b2   :  { %v506_v52 = vmax.f32 %v500_v48, 0.0  ;;  %v775_v41 = vrot.slane %v770_v40, %v774_v39 }
 0x2b3   :  { %v505_v53 = vmax.f32 %v495_v51, 0.0  ;;  %1070 = vmatprep.subr.bf16.mxu1 %v1069_v50 }
 0x2b4   :  { %1072 = vmatpush3.bf16.msra.mxu1 %v1069_v50 }
 0x2b5   :  { %v1073_v54 = vpack.c.bf16 %v506_v52, %v505_v53 }
 0x2b7   :  { %1074 = vmatprep.subr.bf16.mxu1 %v1073_v54 }
 0x2b8   :  { %1076 = vmatpush3.bf16.msra.mxu1 %v1073_v54 }
 0x2b9   :  { %1085 = vmatprep.subr.bf16.mxu1 %v1129_v16 }
 0x2bb   :  { %1009 = vmatmul.mubr.msk.f32.vlgmr.msra.gmra.mrb[4].mxu1 %vm405_vm5, %v508_v55 }
 0x2bc   :  { %1011 = vmatprep.mubr.msk.f32.mxu1 %vm405_vm5, %v509_v56 }
 0x2bf   :  { %1012 = vmatmul.mubr.msk.f32.gmra.mrb[6].mxu1 %vm405_vm5, %v510_v57 }
 0x2c0   :  { %1036 = vmatprep.mubr.msk.f32.mxu1 %vm1130_vm6, %v1131_v17 }
 0x38e   :  { %v1010_v61 = vpop.f32.mrb[4].mxu1 }
 0x38f   :  { %v619_v62 = vadd.f32 %v1010_v61, %v523_v59  ;;  %v613_v63 = vpop.f32.mrb[5].mxu1 }
 0x390   :  { %v614_v0 = vadd.f32 %v613_v63, %v518_v60 }
 0x391   :  { %v633_v1 = vmax.f32 %v619_v62, 0.0 }
 0x392   :  { %v632_v3 = vmax.f32 %v614_v0, 0.0  ;;  %v1013_v4 = vpop.f32.mrb[6].mxu1 }
 0x393   :  { %v629_v6 = vadd.f32 %v1013_v4, %v533_v2  ;;  %v623_v7 = vpop.f32.mrb[7].mxu1 }
 0x394   :  { %v1077_v8 = vpack.c.bf16 %v633_v1, %v632_v3  ;;  %v624_v9 = vadd.f32 %v623_v7, %v528_v5 }
 0x395   :  { %v635_v10 = vmax.f32 %v629_v6, 0.0 }
 0x396   :  { %v634_v11 = vmax.f32 %v624_v9, 0.0  ;;  %1078 = vmatprep.subr.bf16.mxu0 %v1077_v8 }
 0x397   :  { %1080 = vmatpush3.bf16.msra.mxu0 %v1077_v8 }
 0x398   :  { %v1081_v12 = vpack.c.bf16 %v635_v10, %v634_v11 }
 0x39a   :  { %1082 = vmatprep.subr.bf16.mxu0 %v1081_v12 }
 0x39b   :  { %1084 = vmatpush3.bf16.msra.mxu0 %v1081_v12 }
 0x39e   :  { %1023 = vmatmul.mubr.msk.f32.vlgmr.msra.gmra.mrb[12].mxu0 %vm405_vm5, %v637_v13 }
 0x39f   :  { %1025 = vmatprep.mubr.msk.f32.mxu0 %vm405_vm5, %v638_v14 }
 0x3a2   :  { %1026 = vmatmul.mubr.msk.f32.gmra.mrb[14].mxu0 %vm405_vm5, %v639_v15 }
 0x471   :  { %v1024_v20 = vpop.f32.mrb[12].mxu0 }
 0x472   :  { %v748_v21 = vadd.f32 %v1024_v20, %v652_v18  ;;  %v742_v22 = vpop.f32.mrb[13].mxu0 }
 0x473   :  { %v743_v23 = vadd.f32 %v742_v22, %v647_v19 }
 0x474   :  { %v762_v24 = vmax.f32 %v748_v21, 0.0 }
 0x475   :  { %v761_v26 = vmax.f32 %v743_v23, 0.0  ;;  %v1027_v27 = vpop.f32.mrb[14].mxu0 }
 0x476   :  { %v758_v29 = vadd.f32 %v1027_v27, %v662_v25  ;;  %v752_v30 = vpop.f32.mrb[15].mxu0 }
 0x477   :  { %v1086_v31 = vpack.c.bf16 %v762_v24, %v761_v26  ;;  %v753_v32 = vadd.f32 %v752_v30, %v657_v28 }
 0x478   :  { %v764_v33 = vmax.f32 %v758_v29, 0.0 }
 0x479   :  { %v763_v34 = vmax.f32 %v753_v32, 0.0  ;;  %1087 = vmatpush3.bf16.msra.mxu1 %v1086_v31 }
 0x47a   :  { %1088 = vmatprep.subr.bf16.mxu1 %v1129_v16 }
 0x47b   :  { %v1089_v35 = vpack.c.bf16 %v764_v33, %v763_v34 }
 0x47d   :  { %1090 = vmatpush3.bf16.msra.mxu1 %v1089_v35 }
 0x480   :  { %1037 = vmatmul.mubr.msk.f32.vlgmr.msra.gmra.mrb[8].mxu1 %vm405_vm5, %v765_v36 }
 0x553   :  { %v845_v42 = vpop.f32.mrb[8].mxu1 }
 0x554   :  { %v846_v43 = vadd.f32 %v845_v42, %v775_v41  ;;  %v1038_v44 = vpop.f32.mrb[9].mxu1 }
 0x556   :  { %v896_v45 = vmul.f32 -1.442695, %v846_v43 }
 0x558   :  { %1099 = vpow2.f32 %v896_v45 }
 0x562   :  { %v1100_v46 = vpop.eup %1099 }
 0x563   :  { %v852_v47 = vadd.f32 1.0, %v1100_v46 }
 0x565   :  { %1101 = vrcp.f32 %v852_v47 }
 0x56f   :  { %v1102_v48 = vpop.eup %1101 }
 0x570   :  { %855 = vst [vmem:[#allocation3] sm:$0x1] %v1102_v48 }
 0x571   :  { %1114 = shalt.err (!%p1111_p4)
}
 0x572   :  { %s1115_s3 = scalar_lea.hbm %s1409_s13, 16 }
 0x573   :  { %p1116_p5 = scmp.ne.s32.totalorder %s1409_s13, %s1115_s3  ;;  %p1119_p6 = scmp.lt.u32.totalorder %s1115_s3, %s1409_s13 }
 0x575   :  { %p1121_p7 = pnand %p1119_p6, %p1116_p5 }
 0x577   :  { %1124 = shalt.err (!%p1121_p7)
}
 0x578   :  { %865 = dma.vmem_to_hbm [thread:$0]  %s863_s17, 16, %s1409_s13, [#allocation4]  }
 0x579   :  { %1125 = dma.done.wait [#allocation4], 16  }
 0x57a   :  { %1126 = vsyncadd [#allocation4], 4294967280 }
 0x57b   :  { %869 = vsyncpa [#allocation4], 1 }

</bundles_post_ra>
